<compile_context>
chip_gen: v7x
topology: tpu7x:2x2x1
jax: 0.10.0
libtpu: 0.0.40
codegen_flags: <defaults>
</compile_context>

<pallas_src>
import jax
import jax.numpy as jnp
from jax import lax
from jax.experimental import pallas as pl
from jax.experimental.pallas import tpu as pltpu


# Explicit scoped-VMEM limit: above the 16/32 MiB defaults, below v7x's 64 MiB physical.
VMEM_LIMIT_BYTES = 48 * 1024 * 1024


# ----------------------------------------------------------------------------- #
# Dense projection kernel: out = x @ w + b  with K-reduction axis + f32 accumulator
# ----------------------------------------------------------------------------- #
def dense_kernel(x_ref, w_ref, b_ref, o_ref, acc_ref):
    k = pl.program_id(2)

    @pl.when(k == 0)
    def _():
        acc_ref[...] = jnp.zeros_like(acc_ref)

    acc_ref[...] += jnp.dot(x_ref[...], w_ref[...],
                            preferred_element_type=jnp.float32)

    @pl.when(k == pl.num_programs(2) - 1)
    def _():
        o_ref[...] = (acc_ref[...] + b_ref[...]).astype(o_ref.dtype)


def _pick_k_block(K, cap=512):
    if K <= cap:
        return K
    for tk in (512, 384, 256, 128):
        if K % tk == 0:
            return tk
    return K  # fallback: full K (correctness over tiling)


def dense(x, w, b, *, out_dtype=jnp.float32, tm_cap=256, tn_cap=1024):
    """x: (M, K) bf16, w: (K, N) bf16, b: (1, N) f32 -> (M, N) out_dtype."""
    M, K = x.shape
    N = w.shape[1]
    tm = min(M, tm_cap)
    tn = min(N, tn_cap)                  # keep lane-dense, large output tiles
    tk = _pick_k_block(K)                # K-axis must tile exactly (no masked K)
    grid = (pl.cdiv(M, tm), pl.cdiv(N, tn), K // tk)
    return pl.pallas_call(
        dense_kernel,
        out_shape=jax.ShapeDtypeStruct((M, N), out_dtype),
        grid_spec=pltpu.PrefetchScalarGridSpec(
            num_scalar_prefetch=0,
            grid=grid,
            in_specs=[
                pl.BlockSpec((tm, tk), lambda i, j, k: (i, k)),
                pl.BlockSpec((tk, tn), lambda i, j, k: (k, j)),
                pl.BlockSpec((1, tn), lambda i, j, k: (0, j)),
            ],
            out_specs=pl.BlockSpec((tm, tn), lambda i, j, k: (i, j)),
            scratch_shapes=[pltpu.VMEM((tm, tn), jnp.float32)],
        ),
        compiler_params=pltpu.CompilerParams(
            dimension_semantics=("parallel", "parallel", "arbitrary"),
            vmem_limit_bytes=VMEM_LIMIT_BYTES),
    )(x, w, b)


# ----------------------------------------------------------------------------- #
# Recurrent kernel: only the sequential part (h_prev @ W_hh^T + elementwise).
# gx_ref  : (T, TB, 4H) bf16  pre-gates = x @ W_ih^T + (b_ih + b_hh), order [i,f,o,g]
# whh_hbm : (H, 4H)     bf16  recurrent weight, left in HBM (memory_space=ANY)
# h_out   : (T, TB, H)  bf16  hidden states for this (batch-block, time-block)
# whh_vmem: single-buffered VMEM copy of W_hh^T (loaded once per time sweep)
# h_sc/c_sc: f32 carries across the sequential time axis.
# ----------------------------------------------------------------------------- #
def lstm_recurrent_kernel(gx_ref, whh_hbm, h_out_ref, whh_vmem, h_sc, c_sc, sem):
    t_blk = pl.program_id(1)

    @pl.when(t_blk == 0)
    def _():
        # Single-buffered weight load: constant index, so no pipelined double buffer.
        cp = pltpu.make_async_copy(whh_hbm, whh_vmem, sem)
        cp.start()
        cp.wait()
        h_sc[...] = jnp.zeros_like(h_sc)
        c_sc[...] = jnp.zeros_like(c_sc)

    T = gx_ref.shape[0]
    H = h_sc.shape[1]
    whh = whh_vmem[...]

    def step(t, carry):
        h_prev = h_sc[...]
        c_prev = c_sc[...]
        # bf16 matmul operands, f32 accumulate; gate math stays f32.
        gates = gx_ref[t].astype(jnp.float32) + jnp.dot(
            h_prev.astype(jnp.bfloat16), whh, preferred_element_type=jnp.float32)
        sig = jax.nn.sigmoid(gates[:, :3 * H])
        g_g = jnp.tanh(gates[:, 3 * H:])
        i_g = sig[:, 0 * H:1 * H]
        f_g = sig[:, 1 * H:2 * H]
        o_g = sig[:, 2 * H:3 * H]
        c_new = f_g * c_prev + i_g * g_g
        h_new = o_g * jnp.tanh(c_new)
        c_sc[...] = c_new
        h_sc[...] = h_new
        h_out_ref[t] = h_new.astype(h_out_ref.dtype)
        return carry

    # Bounded unroll: keeps vreg pressure (and v5e's single vst slot) sane at big T/H.
    lax.fori_loop(0, T, step, 0, unroll=min(T, 8))


def _pick_batch_block(Bp):
    # Keep >= 128 rows per recurrent matmul (MXU M-dim); only split huge batches,
    # which also lets v7x's two TensorCores take one half each.
    if Bp >= 256 and Bp % 32 == 0:
        return Bp // 2
    return Bp


def _pick_time_block(S, TB, H, budget_bytes=24 * 1024 * 1024, cap=32):
    """Largest T (<= cap) whose double-buffered bf16 blocks fit the VMEM budget."""
    per_t = 2 * (TB * 4 * H * 2) + 2 * (TB * H * 2)          # gx + h_out (x2 buffers)
    fixed = H * 4 * H * 2 + 2 * TB * H * 4                   # whh (x1) + h/c carries
    avail = max(budget_bytes - fixed, per_t)
    return int(max(1, min(cap, S, avail // per_t)))


# ----------------------------------------------------------------------------- #
# Forward pass wrapper
# ----------------------------------------------------------------------------- #
def lstm_seq_forward(tokens, params):
    """tokens: (S, B) int32 -> logits (S, B, V) f32."""
    emb_table = params["embedding"]          # (V, E)  bf16
    wih_t = params["wih_t"]                  # (E, 4H) bf16, gate order i,f,o,g
    whh_t = params["whh_t"]                  # (H, 4H) bf16, gate order i,f,o,g
    bias = params["bias"]                    # (1, 4H) f32, b_ih + b_hh reordered
    wout_t = params["wout_t"]                # (H, V)  bf16
    bout = params["bout"]                    # (1, V)  f32

    S, B = tokens.shape
    E = emb_table.shape[1]
    H = whh_t.shape[0]
    V = wout_t.shape[1]

    # Pad batch to a multiple of 16 (bf16 sublane packing / (16,128) tiles).
    Bp = ((B + 15) // 16) * 16
    tok = tokens if Bp == B else jnp.pad(tokens, ((0, 0), (0, Bp - B)))

    # Embedding lookup (glue, plain JAX gather, bf16 rows = matmul LHS dtype).
    # TODO(synk): fuse this gather into the input-projection kernel via scalar
    # prefetch + pl.Element row index_map to skip the (S,Bp,E) HBM round-trip.
    emb = jnp.take(emb_table, tok, axis=0)                  # (S, Bp, E) bf16

    # 1) Input projection hoisted out of the recurrence (bf16 in, bf16 pre-gates out).
    gx = dense(emb.reshape(S * Bp, E), wih_t, bias,
               out_dtype=jnp.bfloat16).reshape(S, Bp, 4 * H)

    # 2) Sequential recurrence. Time block budgeted against VMEM; S padded to a
    #    multiple of T (padded steps are after the real ones and get sliced off).
    TB = _pick_batch_block(Bp)
    T = _pick_time_block(S, TB, H)
    Sp = ((S + T - 1) // T) * T
    if Sp != S:
        gx = jnp.pad(gx, ((0, Sp - S), (0, 0), (0, 0)))

    hs = pl.pallas_call(
        lstm_recurrent_kernel,
        out_shape=jax.ShapeDtypeStruct((Sp, Bp, H), jnp.bfloat16),
        grid_spec=pltpu.PrefetchScalarGridSpec(
            num_scalar_prefetch=0,
            grid=(Bp // TB, Sp // T),
            in_specs=[
                pl.BlockSpec((T, TB, 4 * H), lambda b, i: (i, b, 0)),   # pre-gates
                pl.BlockSpec(memory_space=pl.ANY),                      # W_hh^T (HBM)
            ],
            out_specs=pl.BlockSpec((T, TB, H), lambda b, i: (i, b, 0)),
            scratch_shapes=[
                pltpu.VMEM((H, 4 * H), jnp.bfloat16),   # single-buffered W_hh^T
                pltpu.VMEM((TB, H), jnp.float32),       # h carry
                pltpu.VMEM((TB, H), jnp.float32),       # c carry
                pltpu.SemaphoreType.DMA(()),            # weight-load DMA sem
            ],
        ),
        compiler_params=pltpu.CompilerParams(
            # batch blocks are independent (megacore-splittable on v7x);
            # the time axis carries h/c in scratch and MUST stay sequential.
            dimension_semantics=("parallel", "arbitrary"),
            vmem_limit_bytes=VMEM_LIMIT_BYTES),
    )(gx, whh_t)

    hs = hs[:S].reshape(S * Bp, H)

    # 3) Output projection hoisted out of the recurrence (bf16 in, f32 logits out).
    logits = dense(hs, wout_t, bout, out_dtype=jnp.float32).reshape(S, Bp, V)
    return logits[:, :B, :]


# ----------------------------------------------------------------------------- #
# Pure-JAX f32 reference mirroring PyTorch nn.LSTM semantics (gate order i, f, g, o)
# ----------------------------------------------------------------------------- #
def lstm_seq_reference(tokens, raw):
    emb = jnp.take(raw["embedding"], tokens, axis=0)      # (S, B, E)
    H = raw["w_hh"].shape[1]
    B = tokens.shape[1]
    wih_t = raw["w_ih"].T
    whh_t = raw["w_hh"].T
    bias = (raw["b_ih"] + raw["b_hh"])[None, :]

    def step(carry, x_t):
        h, c = carry
        gates = x_t @ wih_t + h @ whh_t + bias
        i = jax.nn.sigmoid(gates[:, 0 * H:1 * H])
        f = jax.nn.sigmoid(gates[:, 1 * H:2 * H])
        g = jnp.tanh(gates[:, 2 * H:3 * H])
        o = jax.nn.sigmoid(gates[:, 3 * H:4 * H])
        c = f * c + i * g
        h = o * jnp.tanh(c)
        return (h, c), h

    h0 = jnp.zeros((B, H), jnp.float32)
    c0 = jnp.zeros((B, H), jnp.float32)
    _, hs = jax.lax.scan(step, (h0, c0), emb)
    return hs @ raw["w_out"].T + raw["b_out"][None, :]


# ----------------------------------------------------------------------------- #
# Parameters (PyTorch layout) and kernel-layout preparation
# ----------------------------------------------------------------------------- #
def make_torch_params(key, vocab_size, embed_size, hidden_size):
    ks = jax.random.split(key, 7)
    H = hidden_size
    stdv = 1.0 / (H ** 0.5)
    return {
        "embedding": jax.random.normal(ks[6], (vocab_size, embed_size), jnp.float32),
        "w_ih": jax.random.uniform(ks[0], (4 * H, embed_size), jnp.float32, -stdv, stdv),
        "w_hh": jax.random.uniform(ks[1], (4 * H, H), jnp.float32, -stdv, stdv),
        "b_ih": jax.random.uniform(ks[2], (4 * H,), jnp.float32, -stdv, stdv),
        "b_hh": jax.random.uniform(ks[3], (4 * H,), jnp.float32, -stdv, stdv),
        "w_out": jax.random.uniform(ks[4], (vocab_size, H), jnp.float32, -stdv, stdv),
        "b_out": jax.random.uniform(ks[5], (vocab_size,), jnp.float32, -stdv, stdv),
    }


def _reorder_gates_ifgo_to_ifog(w):
    # Rows are stacked [i, f, g, o] (PyTorch); reorder to [i, f, o, g].
    i, f, g, o = jnp.split(w, 4, axis=0)
    return jnp.concatenate([i, f, o, g], axis=0)


def prepare_kernel_params(raw):
    # Matmul operands in bf16 (native MXU rate on v5e/v6e/v7x, halved weight VMEM
    # and HBM traffic); biases and all gate/carry elementwise math stay f32.
    return {
        "embedding": raw["embedding"].astype(jnp.bfloat16),
        "wih_t": _reorder_gates_ifgo_to_ifog(raw["w_ih"]).T.astype(jnp.bfloat16),
        "whh_t": _reorder_gates_ifgo_to_ifog(raw["w_hh"]).T.astype(jnp.bfloat16),
        "bias": _reorder_gates_ifgo_to_ifog(raw["b_ih"] + raw["b_hh"])[None, :],
        "wout_t": raw["w_out"].T.astype(jnp.bfloat16),                # (H, V)
        "bout": raw["b_out"][None, :],                                # (1, V)
    }


if __name__ == "__main__":
    # Small but TPU-tile-friendly shapes (lane dims are multiples of 128).
    VOCAB, EMBED, HIDDEN = 256, 128, 128
    SEQ, BATCH = 8, 8

    key = jax.random.PRNGKey(0)
    pkey, tkey = jax.random.split(key)
    raw_params = make_torch_params(pkey, VOCAB, EMBED, HIDDEN)
    kernel_params = prepare_kernel_params(raw_params)
    tokens = jax.random.randint(tkey, (SEQ, BATCH), 0, VOCAB, dtype=jnp.int32)

    logits = jax.block_until_ready(lstm_seq_forward(tokens, kernel_params))
    ref = jax.block_until_ready(lstm_seq_reference(tokens, raw_params))

    assert logits.shape == (SEQ, BATCH, VOCAB), logits.shape
    max_err = float(jnp.max(jnp.abs(logits - ref)))
    # bf16 matmul operands / intermediates => looser tolerance than the f32 path.
    assert jnp.allclose(logits, ref, atol=0.15, rtol=0.1), max_err
    print("KERNEL_OK")
</pallas_src>

<mosaic_0001>
module attributes {stable_mosaic.version = 11 : i64} {
  func.func @dense_kernel(%arg0: i32, %arg1: i32, %arg2: i32, %arg3: memref<128x128xbf16, #tpu.memory_space<vmem>>, %arg4: memref<128x512xbf16, #tpu.memory_space<vmem>>, %arg5: memref<1x512xf32, #tpu.memory_space<vmem>>, %arg6: memref<128x512xbf16, #tpu.memory_space<vmem>>, %arg7: memref<128x512xf32, #tpu.memory_space<vmem>>) attributes {dimension_semantics = [#tpu.dimension_semantics<parallel>, #tpu.dimension_semantics<parallel>, #tpu.dimension_semantics<arbitrary>], iteration_bounds = array<i64: 1, 1, 1>, scalar_prefetch = 0 : i64, scratch_operands = 1 : i64, tpu.core_type = #tpu.core_type<tc>, window_params = [{transform_indices = @transform_0, window_bounds = array<i64: 128, 128>}, {transform_indices = @transform_1, window_bounds = array<i64: 128, 512>}, {transform_indices = @transform_2, window_bounds = array<i64: 1, 512>}, {transform_indices = @transform_3, window_bounds = array<i64: 128, 512>}]} {
    %c0_i32 = arith.constant 0 : i32
    %0 = arith.cmpi eq, %arg2, %c0_i32 : i32
    %1 = arith.extui %0 : i1 to i32
    %c0_i32_0 = arith.constant 0 : i32
    %2 = arith.cmpi ne, %1, %c0_i32_0 : i32
    scf.if %2 {
      %cst_10 = arith.constant 0.000000e+00 : f32
      %12 = vector.broadcast %cst_10 : f32 to vector<128x512xf32>
      %c0_11 = arith.constant 0 : index
      %c0_12 = arith.constant 0 : index
      %13 = vector.load %arg7[%c0_11, %c0_12] : memref<128x512xf32, #tpu.memory_space<vmem>>, vector<128x512xf32>
      tpu.vector_store %arg7[%c0_11, %c0_12], %12 {strides = array<i32>} : memref<128x512xf32, #tpu.memory_space<vmem>>, vector<128x512xf32>,
    } else {
    }
    %c0 = arith.constant 0 : index
    %c0_1 = arith.constant 0 : index
    %3 = vector.load %arg7[%c0, %c0_1] : memref<128x512xf32, #tpu.memory_space<vmem>>, vector<128x512xf32>
    %c0_2 = arith.constant 0 : index
    %c0_3 = arith.constant 0 : index
    %4 = vector.load %arg3[%c0_2, %c0_3] : memref<128x128xbf16, #tpu.memory_space<vmem>>, vector<128x128xbf16>
    %c0_4 = arith.constant 0 : index
    %c0_5 = arith.constant 0 : index
    %5 = vector.load %arg4[%c0_4, %c0_5] : memref<128x512xbf16, #tpu.memory_space<vmem>>, vector<128x512xbf16>
    %cst = arith.constant dense<0.000000e+00> : vector<128x512xf32>
    %6 = tpu.matmul %4, %5, %cst {dimension_numbers = #tpu.dot_dimension_numbers<[1], [0], [0], [1], [0, 0, 1, 1], [], []>} : vector<128x128xbf16>, vector<128x512xbf16>, vector<128x512xf32> -> vector<128x512xf32>
    %7 = arith.addf %3, %6 : vector<128x512xf32>
    %c0_6 = arith.constant 0 : index
    %c0_7 = arith.constant 0 : index
    %8 = vector.load %arg7[%c0_6, %c0_7] : memref<128x512xf32, #tpu.memory_space<vmem>>, vector<128x512xf32>
    tpu.vector_store %arg7[%c0_6, %c0_7], %7 {strides = array<i32>} : memref<128x512xf32, #tpu.memory_space<vmem>>, vector<128x512xf32>,
    %c0_i32_8 = arith.constant 0 : i32
    %9 = arith.cmpi eq, %arg2, %c0_i32_8 : i32
    %10 = arith.extui %9 : i1 to i32
    %c0_i32_9 = arith.constant 0 : i32
    %11 = arith.cmpi ne, %10, %c0_i32_9 : i32
    scf.if %11 {
      %c0_10 = arith.constant 0 : index
      %c0_11 = arith.constant 0 : index
      %12 = vector.load %arg7[%c0_10, %c0_11] : memref<128x512xf32, #tpu.memory_space<vmem>>, vector<128x512xf32>
      %c0_12 = arith.constant 0 : index
      %c0_13 = arith.constant 0 : index
      %13 = vector.load %arg5[%c0_12, %c0_13] : memref<1x512xf32, #tpu.memory_space<vmem>>, vector<1x512xf32>
      %14 = vector.broadcast %13 : vector<1x512xf32> to vector<128x512xf32>
      %15 = arith.addf %12, %14 : vector<128x512xf32>
      %16 = arith.truncf %15 : vector<128x512xf32> to vector<128x512xbf16>
      %c0_14 = arith.constant 0 : index
      %c0_15 = arith.constant 0 : index
      %17 = vector.load %arg6[%c0_14, %c0_15] : memref<128x512xbf16, #tpu.memory_space<vmem>>, vector<128x512xbf16>
      tpu.vector_store %arg6[%c0_14, %c0_15], %16 {strides = array<i32>} : memref<128x512xbf16, #tpu.memory_space<vmem>>, vector<128x512xbf16>,
    } else {
    }
    return
  }
  func.func @transform_0(%arg0: i32, %arg1: i32, %arg2: i32) -> (i32, i32) {
    %c0_i32 = arith.constant 0 : i32
    return %arg0, %arg2 : i32, i32
  }
  func.func @transform_1(%arg0: i32, %arg1: i32, %arg2: i32) -> (i32, i32) {
    %c0_i32 = arith.constant 0 : i32
    return %arg2, %arg1 : i32, i32
  }
  func.func @transform_2(%arg0: i32, %arg1: i32, %arg2: i32) -> (i32, i32) {
    %c0_i32 = arith.constant 0 : i32
    %c0_i32_0 = arith.constant 0 : i32
    return %c0_i32, %arg1 : i32, i32
  }
  func.func @transform_3(%arg0: i32, %arg1: i32, %arg2: i32) -> (i32, i32) {
    %c0_i32 = arith.constant 0 : i32
    return %arg0, %arg1 : i32, i32
  }
}

</mosaic_0001>

<bundles_post_ra>
// kernel: tpu_custom_call.1
= control target key start
LH: loop header
LB: loop body
LE: loop exit
PB: predicated region body
PF: predicated region fallthrough
CT: control target
= control target key end

     0   :  { %8 = vsyncpa [#allocation4], 0  ;;  %s1582_s0 = inlined_call_operand.hbm [shape: bf16[128,128], index: 0, kind: input, shape index: {}]   ;;  %s1583_s1 = inlined_call_operand.hbm [shape: bf16[128,512], index: 1, kind: input, shape index: {}]   ;;  %s1584_s2 = inlined_call_operand.vmem [shape: f32[1,512], index: 2, kind: input, shape index: {}]   ;;  %s1585_s3 = inlined_call_operand.hbm [shape: bf16[128,512], index: 3, kind: output, shape index: {}]  }
   0x1   :  { %9 = vsyncpa [#allocation7], 0 }
   0x2   :  { %10 = vsyncpa [#allocation5], 0  ;;  %s1421_s12 = smov [#allocation3]   ;;  %s1349_s16 = scalar_lea.hbm %s1582_s0, 1024 }
   0x3   :  { %s16_s13 = sshll.u32 %s1421_s12, 4  ;;  %p1350_p0 = scmp.ne.s32.totalorder %s1582_s0, %s1349_s16  ;;  %s17_s13 = int_to_ptr.vmem [resolvable:$true] %s16_s13 }
   0x4   :  { %p1353_p1 = scmp.lt.u32.totalorder %s1349_s16, %s1582_s0 }
   0x6   :  { %p1355_p2 = pnand %p1353_p1, %p1350_p0 }
   0x8   :  { %1358 = shalt.err (!%p1355_p2)
}
   0x9   :  { %s1359_s21 = scalar_lea.vmem %s17_s13, 1024  ;;  %p1364_p4 = scmp.lt.s32.totalorder %s17_s13, %s17_s13 }
   0xa   :  { %p1360_p3 = scmp.ne.s32.totalorder %s17_s13, %s1359_s21  ;;  %p1365_p5 = scmp.lt.s32.totalorder %s1359_s21, %s1359_s21 }
   0xc   :  { %p1366_p6 = por %p1365_p5, %p1364_p4 }
   0xe   :  { %p1367_p7 = pnand %p1366_p6, %p1360_p3 }
  0x10   :  { %1370 = shalt.err (!%p1367_p7)
}
  0x11   :  { %s1422_s22 = smov 64   ;;  %s1423_s23 = smov 4  }
  0x12   :  { %22 = dma.hbm_to_vmem [thread:$0]  %s1582_s0, 1024, %s17_s13, [#allocation4], %s1422_s22, %s1422_s22, %s1423_s23  }
  0x13   :  { %s1424_s26 = smov [#allocation6]   ;;  %s1371_s30 = scalar_lea.hbm %s1583_s1, 4096 }
  0x14   :  { %s28_s27 = sshll.u32 %s1424_s26, 4  ;;  %p1372_p8 = scmp.ne.s32.totalorder %s1583_s1, %s1371_s30  ;;  %s29_s27 = int_to_ptr.vmem [resolvable:$true] %s28_s27 }
  0x15   :  { %p1375_p9 = scmp.lt.u32.totalorder %s1371_s30, %s1583_s1 }
  0x17   :  { %p1377_p10 = pnand %p1375_p9, %p1372_p8 }
  0x19   :  { %1380 = shalt.err (!%p1377_p10)
}
  0x1a   :  { %s1381_s8 = scalar_lea.vmem %s29_s27, 4096  ;;  %p1386_p12 = scmp.lt.s32.totalorder %s29_s27, %s29_s27 }
  0x1b   :  { %p1382_p11 = scmp.ne.s32.totalorder %s29_s27, %s1381_s8  ;;  %p1387_p13 = scmp.lt.s32.totalorder %s1381_s8, %s1381_s8 }
  0x1d   :  { %p1388_p0 = por %p1387_p13, %p1386_p12 }
  0x1f   :  { %p1389_p1 = pnand %p1388_p0, %p1382_p11 }
  0x21   :  { %1392 = shalt.err (!%p1389_p1)
}
  0x22   :  { %s1425_s0 = smov 256   ;;  %s1426_s9 = smov 16  }
  0x23   :  { %34 = dma.hbm_to_vmem [thread:$0]  %s1583_s1, 4096, %s29_s27, [#allocation7], %s1425_s0, %s1425_s0, %s1426_s9  }
  0x24   :  { %1415 = dma.done.wait [#allocation4], 1024  }
  0x25   :  { %1416 = vsyncadd [#allocation4], 4294966272 }
  0x26   :  { %1417 = dma.done.wait [#allocation7], 4096  }
  0x27   :  { %1418 = vsyncadd [#allocation7], 4294963200  ;;  %v1427_v0 = vmov 0   ;;  %v1293_v1 = vld [vmem:[#allocation6 + $0x4] ss:$16 sps:$4 sm:$0xff]   ;;  %v1342_v34 = vld [vmem:[#allocation3 + $0x8] sm:$0xff]   ;;  %v855_v41 = vlaneseq }
  0x28   :  { %464 = vmatprep.mubr.bf16.mxu0 %v1427_v0  ;;  %577 = vmatprep.mubr.bf16.mxu1 %v1427_v0  ;;  %v1295_v2 = vld [vmem:[#allocation6 + $0xc] ss:$16 sps:$4 sm:$0xff]   ;;  %v1297_v3 = vld [vmem:[#allocation6] ss:$16 sps:$4 sm:$0xff]   ;;  %v1298_v4 = vld [vmem:[#allocation6 + $0x8] ss:$16 sps:$4 sm:$0xff]  }
  0x29   :  { %432 = vmatprep.subr.bf16.mxu0 %v1293_v1  ;;  %545 = vmatprep.subr.bf16.mxu1 %v1295_v2  ;;  %v1299_v5 = vld [vmem:[#allocation6 + $0x24] ss:$16 sps:$4 sm:$0xff]   ;;  %v1301_v6 = vld [vmem:[#allocation6 + $0x2c] ss:$16 sps:$4 sm:$0xff]   ;;  %v1303_v7 = vld [vmem:[#allocation6 + $0x20] ss:$16 sps:$4 sm:$0xff]  }
  0x2a   :  { %433 = vmatpush1.bf16.msra.mxu0 %v1297_v3  ;;  %546 = vmatpush1.bf16.msra.mxu1 %v1298_v4  ;;  %v1304_v8 = vld [vmem:[#allocation6 + $0x28] ss:$16 sps:$4 sm:$0xff]   ;;  %v1305_v9 = vld [vmem:[#allocation6 + $0x44] ss:$16 sps:$4 sm:$0xff]   ;;  %v1307_v10 = vld [vmem:[#allocation6 + $0x4c] ss:$16 sps:$4 sm:$0xff]  }
  0x2b   :  { %434 = vmatprep.subr.bf16.mxu0 %v1299_v5  ;;  %547 = vmatprep.subr.bf16.mxu1 %v1301_v6  ;;  %v1309_v11 = vld [vmem:[#allocation6 + $0x40] ss:$16 sps:$4 sm:$0xff]   ;;  %v1310_v12 = vld [vmem:[#allocation6 + $0x48] ss:$16 sps:$4 sm:$0xff]   ;;  %v1311_v13 = vld [vmem:[#allocation6 + $0x64] ss:$16 sps:$4 sm:$0xff]  }
  0x2c   :  { %v1313_v14 = vld [vmem:[#allocation6 + $0x6c] ss:$16 sps:$4 sm:$0xff]   ;;  %v1315_v15 = vld [vmem:[#allocation6 + $0x60] ss:$16 sps:$4 sm:$0xff]   ;;  %v1316_v16 = vld [vmem:[#allocation6 + $0x68] ss:$16 sps:$4 sm:$0xff]  }
  0x2d   :  { %v1317_v17 = vld [vmem:[#allocation6 + $0x84] ss:$16 sps:$4 sm:$0xff]   ;;  %v1319_v18 = vld [vmem:[#allocation6 + $0x8c] ss:$16 sps:$4 sm:$0xff]   ;;  %v1321_v19 = vld [vmem:[#allocation6 + $0x80] ss:$16 sps:$4 sm:$0xff]  }
  0x2e   :  { %435 = vmatpush1.bf16.msra.mxu0 %v1303_v7  ;;  %548 = vmatpush1.bf16.msra.mxu1 %v1304_v8  ;;  %v1322_v20 = vld [vmem:[#allocation6 + $0x88] ss:$16 sps:$4 sm:$0xff]   ;;  %v1323_v21 = vld [vmem:[#allocation6 + $0xa4] ss:$16 sps:$4 sm:$0xff]   ;;  %v1325_v22 = vld [vmem:[#allocation6 + $0xac] ss:$16 sps:$4 sm:$0xff]  }
  0x2f   :  { %436 = vmatprep.subr.bf16.mxu0 %v1305_v9  ;;  %549 = vmatprep.subr.bf16.mxu1 %v1307_v10  ;;  %v1327_v23 = vld [vmem:[#allocation6 + $0xa0] ss:$16 sps:$4 sm:$0xff]   ;;  %v1328_v24 = vld [vmem:[#allocation6 + $0xa8] ss:$16 sps:$4 sm:$0xff]   ;;  %v1329_v25 = vld [vmem:[#allocation6 + $0xc4] ss:$16 sps:$4 sm:$0xff]  }
  0x30   :  { %v1331_v26 = vld [vmem:[#allocation6 + $0xcc] ss:$16 sps:$4 sm:$0xff]   ;;  %v1333_v27 = vld [vmem:[#allocation6 + $0xc0] ss:$16 sps:$4 sm:$0xff]   ;;  %v1334_v28 = vld [vmem:[#allocation6 + $0xc8] ss:$16 sps:$4 sm:$0xff]  }
  0x31   :  { %v1335_v29 = vld [vmem:[#allocation6 + $0xe4] ss:$16 sps:$4 sm:$0xff]   ;;  %v1337_v30 = vld [vmem:[#allocation6 + $0xec] ss:$16 sps:$4 sm:$0xff]   ;;  %v1339_v31 = vld [vmem:[#allocation6 + $0xe0] ss:$16 sps:$4 sm:$0xff]  }
  0x32   :  { %437 = vmatpush1.bf16.msra.mxu0 %v1309_v11  ;;  %550 = vmatpush1.bf16.msra.mxu1 %v1310_v12  ;;  %v1340_v32 = vld [vmem:[#allocation6 + $0xe8] ss:$16 sps:$4 sm:$0xff]   ;;  %v1341_v33 = vld [vmem:[#allocation3] sm:$0xff]   ;;  %v1343_v35 = vld [vmem:[#allocation3 + $0x10] sm:$0xff]   ;;  %v856_v42 = vshrl.u32 %v855_v41, 7 }
  0x33   :  { %438 = vmatprep.subr.bf16.mxu0 %v1311_v13  ;;  %551 = vmatprep.subr.bf16.mxu1 %v1313_v14  ;;  %v1344_v36 = vld [vmem:[#allocation3 + $0x18] sm:$0xff]   ;;  %v1345_v37 = vld [vmem:[#allocation3 + $0x20] sm:$0xff]   ;;  %v1346_v38 = vld [vmem:[#allocation3 + $0x28] sm:$0xff]  }
  0x34   :  { %v1347_v39 = vld [vmem:[#allocation3 + $0x30] sm:$0xff]   ;;  %v1348_v40 = vld [vmem:[#allocation3 + $0x38] sm:$0xff]   ;;  %v857_v43 = vsub.s32 0, %v856_v42  ;;  %v865_v44 = vsub.s32 2, %v856_v42  ;;  %v853_v45 = vld [vmem:[%s1584_s2] sm:$0xf] }
  0x35   :  { %v861_v46 = vsub.s32 1, %v856_v42  ;;  %v869_v47 = vsub.s32 3, %v856_v42  ;;  %s1428_s2 = smov [#allocation8]  }
  0x36   :  { %439 = vmatpush1.bf16.msra.mxu0 %v1315_v15  ;;  %552 = vmatpush1.bf16.msra.mxu1 %v1316_v16  ;;  %v1495_v48 = vrot.slane %v853_v45, %v857_v43  ;;  %v1497_v49 = vrot.slane %v853_v45, %v865_v44  ;;  %s1168_s13 = sshll.u32 %s1428_s2, 4  ;;  %s1169_s13 = int_to_ptr.vmem [resolvable:$true] %s1168_s13 }
  0x37   :  { %440 = vmatprep.subr.bf16.mxu0 %v1317_v17  ;;  %553 = vmatprep.subr.bf16.mxu1 %v1319_v18  ;;  %v1499_v50 = vrot.slane %v853_v45, %v861_v46  ;;  %v1501_v51 = vrot.slane %v853_v45, %v869_v47  ;;  %s1393_s14 = scalar_lea.vmem %s1169_s13, 4096  ;;  %p1398_p3 = scmp.lt.s32.totalorder %s1169_s13, %s1169_s13 }
  0x38   :  { %p1394_p2 = scmp.ne.s32.totalorder %s1169_s13, %s1393_s14  ;;  %p1399_p4 = scmp.lt.s32.totalorder %s1393_s14, %s1393_s14 }
  0x3a   :  { %441 = vmatpush1.bf16.msra.mxu0 %v1321_v19  ;;  %554 = vmatpush1.bf16.msra.mxu1 %v1322_v20  ;;  %p1400_p5 = por %p1399_p4, %p1398_p3 }
  0x3b   :  { %442 = vmatprep.subr.bf16.mxu0 %v1323_v21  ;;  %555 = vmatprep.subr.bf16.mxu1 %v1325_v22 }
  0x3c   :  { %p1401_p6 = pnand %p1400_p5, %p1394_p2 }
  0x3e   :  { %443 = vmatpush1.bf16.msra.mxu0 %v1327_v23  ;;  %556 = vmatpush1.bf16.msra.mxu1 %v1328_v24 }
  0x3f   :  { %444 = vmatprep.subr.bf16.mxu0 %v1329_v25  ;;  %557 = vmatprep.subr.bf16.mxu1 %v1331_v26 }
  0x42   :  { %445 = vmatpush1.bf16.msra.mxu0 %v1333_v27  ;;  %558 = vmatpush1.bf16.msra.mxu1 %v1334_v28 }
  0x43   :  { %446 = vmatprep.subr.bf16.mxu0 %v1335_v29  ;;  %559 = vmatprep.subr.bf16.mxu1 %v1337_v30 }
  0x46   :  { %447 = vmatpush1.bf16.msra.mxu0 %v1339_v31  ;;  %560 = vmatpush1.bf16.msra.mxu1 %v1340_v32 }
  0x49   :  { %465 = vmatmul.mubr.bf16.vlgmr.msra.gmra.mrb[0].mxu0 %v1341_v33  ;;  %578 = vmatmul.mubr.bf16.vlgmr.msra.gmra.mrb[0].mxu1 %v1341_v33 }
  0x4a   :  { %474 = vmatprep.mubr.bf16.mxu0 %v1427_v0  ;;  %587 = vmatprep.mubr.bf16.mxu1 %v1427_v0 }
  0x51   :  { %475 = vmatmul.mubr.bf16.gmra.mrb[4].mxu0 %v1342_v34  ;;  %588 = vmatmul.mubr.bf16.gmra.mrb[4].mxu1 %v1342_v34 }
  0x52   :  { %484 = vmatprep.mubr.bf16.mxu0 %v1427_v0  ;;  %597 = vmatprep.mubr.bf16.mxu1 %v1427_v0 }
  0x59   :  { %485 = vmatmul.mubr.bf16.gmra.mrb[8].mxu0 %v1343_v35  ;;  %598 = vmatmul.mubr.bf16.gmra.mrb[8].mxu1 %v1343_v35 }
  0x5a   :  { %494 = vmatprep.mubr.bf16.mxu0 %v1427_v0  ;;  %607 = vmatprep.mubr.bf16.mxu1 %v1427_v0 }
  0x61   :  { %495 = vmatmul.mubr.bf16.gmra.mrb[12].mxu0 %v1344_v36  ;;  %608 = vmatmul.mubr.bf16.gmra.mrb[12].mxu1 %v1344_v36 }
  0x62   :  { %504 = vmatprep.mubr.bf16.mxu0 %v1427_v0  ;;  %617 = vmatprep.mubr.bf16.mxu1 %v1427_v0 }
  0x69   :  { %505 = vmatmul.mubr.bf16.gmra.mrb[16].mxu0 %v1345_v37  ;;  %618 = vmatmul.mubr.bf16.gmra.mrb[16].mxu1 %v1345_v37 }
  0x6a   :  { %514 = vmatprep.mubr.bf16.mxu0 %v1427_v0  ;;  %627 = vmatprep.mubr.bf16.mxu1 %v1427_v0 }
  0x71   :  { %515 = vmatmul.mubr.bf16.gmra.mrb[20].mxu0 %v1346_v38  ;;  %628 = vmatmul.mubr.bf16.gmra.mrb[20].mxu1 %v1346_v38 }
  0x72   :  { %524 = vmatprep.mubr.bf16.mxu0 %v1427_v0  ;;  %637 = vmatprep.mubr.bf16.mxu1 %v1427_v0 }
  0x79   :  { %525 = vmatmul.mubr.bf16.gmra.mrb[24].mxu0 %v1347_v39  ;;  %638 = vmatmul.mubr.bf16.gmra.mrb[24].mxu1 %v1347_v39 }
  0x7a   :  { %534 = vmatprep.mubr.bf16.mxu0 %v1427_v0  ;;  %647 = vmatprep.mubr.bf16.mxu1 %v1427_v0 }
  0x81   :  { %535 = vmatmul.mubr.bf16.gmra.mrb[28].mxu0 %v1348_v40  ;;  %648 = vmatmul.mubr.bf16.gmra.mrb[28].mxu1 %v1348_v40 }
 0x11c   :  { %v466_v52 = vpop.f32.mrb[0].mxu0  ;;  %v579_v53 = vpop.f32.mrb[0].mxu1 }
 0x11d   :  { %v875_v54 = vadd.f32 %v1495_v48, %v466_v52  ;;  %v877_v55 = vadd.f32 %v1497_v49, %v579_v53  ;;  %v468_v56 = vpop.f32.mrb[1].mxu0  ;;  %v581_v57 = vpop.f32.mrb[1].mxu1 }
 0x11e   :  { %v876_v58 = vadd.f32 %v1499_v50, %v468_v56  ;;  %v878_v59 = vadd.f32 %v1501_v51, %v581_v57  ;;  %v470_v60 = vpop.f32.mrb[2].mxu0  ;;  %v583_v61 = vpop.f32.mrb[2].mxu1 }
 0x11f   :  { %v879_v62 = vadd.f32 %v1495_v48, %v470_v60  ;;  %v881_v63 = vadd.f32 %v1497_v49, %v583_v61  ;;  %v472_v0 = vpop.f32.mrb[3].mxu0  ;;  %v585_v1 = vpop.f32.mrb[3].mxu1 }
 0x120   :  { %v1253_v2 = vpack.c.bf16 %v876_v58, %v875_v54  ;;  %v1254_v3 = vpack.c.bf16 %v878_v59, %v877_v55  ;;  %v880_v4 = vadd.f32 %v1499_v50, %v472_v0  ;;  %v882_v5 = vadd.f32 %v1501_v51, %v585_v1 }
 0x122   :  { %1131 = vst [vmem:[#allocation8] sm:$0xff] %v1253_v2  ;;  %1132 = vst [vmem:[#allocation8 + $0x8] sm:$0xff] %v1254_v3  ;;  %v1255_v6 = vpack.c.bf16 %v880_v4, %v879_v62  ;;  %v1256_v7 = vpack.c.bf16 %v882_v5, %v881_v63 }
 0x124   :  { %1133 = vst [vmem:[#allocation8 + $0x10] sm:$0xff] %v1255_v6  ;;  %1134 = vst [vmem:[#allocation8 + $0x18] sm:$0xff] %v1256_v7  ;;  %v476_v8 = vpop.f32.mrb[4].mxu0  ;;  %v589_v9 = vpop.f32.mrb[4].mxu1 }
 0x125   :  { %v883_v10 = vadd.f32 %v1495_v48, %v476_v8  ;;  %v885_v11 = vadd.f32 %v1497_v49, %v589_v9  ;;  %v478_v12 = vpop.f32.mrb[5].mxu0  ;;  %v591_v13 = vpop.f32.mrb[5].mxu1 }
 0x126   :  { %v884_v14 = vadd.f32 %v1499_v50, %v478_v12  ;;  %v886_v15 = vadd.f32 %v1501_v51, %v591_v13  ;;  %v480_v16 = vpop.f32.mrb[6].mxu0  ;;  %v593_v17 = vpop.f32.mrb[6].mxu1 }
 0x127   :  { %v887_v18 = vadd.f32 %v1495_v48, %v480_v16  ;;  %v889_v19 = vadd.f32 %v1497_v49, %v593_v17  ;;  %v482_v20 = vpop.f32.mrb[7].mxu0  ;;  %v595_v21 = vpop.f32.mrb[7].mxu1 }
 0x128   :  { %v1257_v22 = vpack.c.bf16 %v884_v14, %v883_v10  ;;  %v1258_v23 = vpack.c.bf16 %v886_v15, %v885_v11  ;;  %v888_v24 = vadd.f32 %v1499_v50, %v482_v20  ;;  %v890_v25 = vadd.f32 %v1501_v51, %v595_v21 }
 0x12a   :  { %1135 = vst [vmem:[#allocation8 + $0x20] sm:$0xff] %v1257_v22  ;;  %1136 = vst [vmem:[#allocation8 + $0x28] sm:$0xff] %v1258_v23  ;;  %v1259_v26 = vpack.c.bf16 %v888_v24, %v887_v18  ;;  %v1260_v27 = vpack.c.bf16 %v890_v25, %v889_v19 }
 0x12c   :  { %1137 = vst [vmem:[#allocation8 + $0x30] sm:$0xff] %v1259_v26  ;;  %1138 = vst [vmem:[#allocation8 + $0x38] sm:$0xff] %v1260_v27  ;;  %v486_v28 = vpop.f32.mrb[8].mxu0  ;;  %v599_v29 = vpop.f32.mrb[8].mxu1 }
 0x12d   :  { %v891_v30 = vadd.f32 %v1495_v48, %v486_v28  ;;  %v893_v31 = vadd.f32 %v1497_v49, %v599_v29  ;;  %v488_v32 = vpop.f32.mrb[9].mxu0  ;;  %v601_v33 = vpop.f32.mrb[9].mxu1 }
 0x12e   :  { %v892_v34 = vadd.f32 %v1499_v50, %v488_v32  ;;  %v894_v35 = vadd.f32 %v1501_v51, %v601_v33  ;;  %v490_v36 = vpop.f32.mrb[10].mxu0  ;;  %v603_v37 = vpop.f32.mrb[10].mxu1 }
 0x12f   :  { %v895_v38 = vadd.f32 %v1495_v48, %v490_v36  ;;  %v897_v39 = vadd.f32 %v1497_v49, %v603_v37  ;;  %v492_v40 = vpop.f32.mrb[11].mxu0  ;;  %v605_v41 = vpop.f32.mrb[11].mxu1 }
 0x130   :  { %v1261_v42 = vpack.c.bf16 %v892_v34, %v891_v30  ;;  %v1262_v43 = vpack.c.bf16 %v894_v35, %v893_v31  ;;  %v896_v44 = vadd.f32 %v1499_v50, %v492_v40  ;;  %v898_v45 = vadd.f32 %v1501_v51, %v605_v41 }
 0x132   :  { %1139 = vst [vmem:[#allocation8 + $0x40] sm:$0xff] %v1261_v42  ;;  %1140 = vst [vmem:[#allocation8 + $0x48] sm:$0xff] %v1262_v43  ;;  %v1263_v46 = vpack.c.bf16 %v896_v44, %v895_v38  ;;  %v1264_v47 = vpack.c.bf16 %v898_v45, %v897_v39 }
 0x134   :  { %1141 = vst [vmem:[#allocation8 + $0x50] sm:$0xff] %v1263_v46  ;;  %1142 = vst [vmem:[#allocation8 + $0x58] sm:$0xff] %v1264_v47  ;;  %v496_v52 = vpop.f32.mrb[12].mxu0  ;;  %v609_v53 = vpop.f32.mrb[12].mxu1 }
 0x135   :  { %v899_v54 = vadd.f32 %v1495_v48, %v496_v52  ;;  %v901_v55 = vadd.f32 %v1497_v49, %v609_v53  ;;  %v498_v56 = vpop.f32.mrb[13].mxu0  ;;  %v611_v57 = vpop.f32.mrb[13].mxu1 }
 0x136   :  { %v900_v58 = vadd.f32 %v1499_v50, %v498_v56  ;;  %v902_v59 = vadd.f32 %v1501_v51, %v611_v57  ;;  %v500_v60 = vpop.f32.mrb[14].mxu0  ;;  %v613_v61 = vpop.f32.mrb[14].mxu1 }
 0x137   :  { %v903_v62 = vadd.f32 %v1495_v48, %v500_v60  ;;  %v905_v63 = vadd.f32 %v1497_v49, %v613_v61  ;;  %v502_v0 = vpop.f32.mrb[15].mxu0  ;;  %v615_v1 = vpop.f32.mrb[15].mxu1 }
 0x138   :  { %v1265_v2 = vpack.c.bf16 %v900_v58, %v899_v54  ;;  %v1266_v3 = vpack.c.bf16 %v902_v59, %v901_v55  ;;  %v904_v4 = vadd.f32 %v1499_v50, %v502_v0  ;;  %v906_v5 = vadd.f32 %v1501_v51, %v615_v1 }
 0x13a   :  { %1143 = vst [vmem:[#allocation8 + $0x60] sm:$0xff] %v1265_v2  ;;  %1144 = vst [vmem:[#allocation8 + $0x68] sm:$0xff] %v1266_v3  ;;  %v1267_v6 = vpack.c.bf16 %v904_v4, %v903_v62  ;;  %v1268_v7 = vpack.c.bf16 %v906_v5, %v905_v63 }
 0x13c   :  { %1145 = vst [vmem:[#allocation8 + $0x70] sm:$0xff] %v1267_v6  ;;  %1146 = vst [vmem:[#allocation8 + $0x78] sm:$0xff] %v1268_v7  ;;  %v506_v8 = vpop.f32.mrb[16].mxu0  ;;  %v619_v9 = vpop.f32.mrb[16].mxu1 }
 0x13d   :  { %v907_v10 = vadd.f32 %v1495_v48, %v506_v8  ;;  %v909_v11 = vadd.f32 %v1497_v49, %v619_v9  ;;  %v508_v12 = vpop.f32.mrb[17].mxu0  ;;  %v621_v13 = vpop.f32.mrb[17].mxu1 }
 0x13e   :  { %v908_v14 = vadd.f32 %v1499_v50, %v508_v12  ;;  %v910_v15 = vadd.f32 %v1501_v51, %v621_v13  ;;  %v510_v16 = vpop.f32.mrb[18].mxu0  ;;  %v623_v17 = vpop.f32.mrb[18].mxu1 }
 0x13f   :  { %v911_v18 = vadd.f32 %v1495_v48, %v510_v16  ;;  %v913_v19 = vadd.f32 %v1497_v49, %v623_v17  ;;  %v512_v20 = vpop.f32.mrb[19].mxu0  ;;  %v625_v21 = vpop.f32.mrb[19].mxu1 }
 0x140   :  { %v1269_v22 = vpack.c.bf16 %v908_v14, %v907_v10  ;;  %v1270_v23 = vpack.c.bf16 %v910_v15, %v909_v11  ;;  %v912_v24 = vadd.f32 %v1499_v50, %v512_v20  ;;  %v914_v25 = vadd.f32 %v1501_v51, %v625_v21 }
 0x142   :  { %1147 = vst [vmem:[#allocation8 + $0x80] sm:$0xff] %v1269_v22  ;;  %1148 = vst [vmem:[#allocation8 + $0x88] sm:$0xff] %v1270_v23  ;;  %v1271_v26 = vpack.c.bf16 %v912_v24, %v911_v18  ;;  %v1272_v27 = vpack.c.bf16 %v914_v25, %v913_v19 }
 0x144   :  { %1149 = vst [vmem:[#allocation8 + $0x90] sm:$0xff] %v1271_v26  ;;  %1150 = vst [vmem:[#allocation8 + $0x98] sm:$0xff] %v1272_v27  ;;  %v516_v28 = vpop.f32.mrb[20].mxu0  ;;  %v629_v29 = vpop.f32.mrb[20].mxu1 }
 0x145   :  { %v915_v30 = vadd.f32 %v1495_v48, %v516_v28  ;;  %v917_v31 = vadd.f32 %v1497_v49, %v629_v29  ;;  %v518_v32 = vpop.f32.mrb[21].mxu0  ;;  %v631_v33 = vpop.f32.mrb[21].mxu1 }
 0x146   :  { %v916_v34 = vadd.f32 %v1499_v50, %v518_v32  ;;  %v918_v35 = vadd.f32 %v1501_v51, %v631_v33  ;;  %v520_v36 = vpop.f32.mrb[22].mxu0  ;;  %v633_v37 = vpop.f32.mrb[22].mxu1 }
 0x147   :  { %v919_v38 = vadd.f32 %v1495_v48, %v520_v36  ;;  %v921_v39 = vadd.f32 %v1497_v49, %v633_v37  ;;  %v522_v40 = vpop.f32.mrb[23].mxu0  ;;  %v635_v41 = vpop.f32.mrb[23].mxu1 }
 0x148   :  { %v1273_v42 = vpack.c.bf16 %v916_v34, %v915_v30  ;;  %v1274_v43 = vpack.c.bf16 %v918_v35, %v917_v31  ;;  %v920_v44 = vadd.f32 %v1499_v50, %v522_v40  ;;  %v922_v45 = vadd.f32 %v1501_v51, %v635_v41 }
 0x14a   :  { %1151 = vst [vmem:[#allocation8 + $0xa0] sm:$0xff] %v1273_v42  ;;  %1152 = vst [vmem:[#allocation8 + $0xa8] sm:$0xff] %v1274_v43  ;;  %v1275_v46 = vpack.c.bf16 %v920_v44, %v919_v38  ;;  %v1276_v47 = vpack.c.bf16 %v922_v45, %v921_v39 }
 0x14c   :  { %1153 = vst [vmem:[#allocation8 + $0xb0] sm:$0xff] %v1275_v46  ;;  %1154 = vst [vmem:[#allocation8 + $0xb8] sm:$0xff] %v1276_v47  ;;  %v526_v52 = vpop.f32.mrb[24].mxu0  ;;  %v639_v53 = vpop.f32.mrb[24].mxu1 }
 0x14d   :  { %v923_v54 = vadd.f32 %v1495_v48, %v526_v52  ;;  %v925_v55 = vadd.f32 %v1497_v49, %v639_v53  ;;  %v528_v56 = vpop.f32.mrb[25].mxu0  ;;  %v641_v57 = vpop.f32.mrb[25].mxu1 }
 0x14e   :  { %v924_v58 = vadd.f32 %v1499_v50, %v528_v56  ;;  %v926_v59 = vadd.f32 %v1501_v51, %v641_v57  ;;  %v530_v60 = vpop.f32.mrb[26].mxu0  ;;  %v643_v61 = vpop.f32.mrb[26].mxu1 }
 0x14f   :  { %v927_v62 = vadd.f32 %v1495_v48, %v530_v60  ;;  %v929_v63 = vadd.f32 %v1497_v49, %v643_v61  ;;  %v532_v0 = vpop.f32.mrb[27].mxu0  ;;  %v645_v1 = vpop.f32.mrb[27].mxu1 }
 0x150   :  { %v1277_v2 = vpack.c.bf16 %v924_v58, %v923_v54  ;;  %v1278_v3 = vpack.c.bf16 %v926_v59, %v925_v55  ;;  %v928_v4 = vadd.f32 %v1499_v50, %v532_v0  ;;  %v930_v5 = vadd.f32 %v1501_v51, %v645_v1 }
 0x152   :  { %1155 = vst [vmem:[#allocation8 + $0xc0] sm:$0xff] %v1277_v2  ;;  %1156 = vst [vmem:[#allocation8 + $0xc8] sm:$0xff] %v1278_v3  ;;  %v1279_v6 = vpack.c.bf16 %v928_v4, %v927_v62  ;;  %v1280_v7 = vpack.c.bf16 %v930_v5, %v929_v63 }
 0x154   :  { %1157 = vst [vmem:[#allocation8 + $0xd0] sm:$0xff] %v1279_v6  ;;  %1158 = vst [vmem:[#allocation8 + $0xd8] sm:$0xff] %v1280_v7  ;;  %v536_v8 = vpop.f32.mrb[28].mxu0  ;;  %v649_v9 = vpop.f32.mrb[28].mxu1 }
 0x155   :  { %v931_v10 = vadd.f32 %v1495_v48, %v536_v8  ;;  %v933_v11 = vadd.f32 %v1497_v49, %v649_v9  ;;  %v538_v12 = vpop.f32.mrb[29].mxu0  ;;  %v651_v13 = vpop.f32.mrb[29].mxu1 }
 0x156   :  { %v932_v14 = vadd.f32 %v1499_v50, %v538_v12  ;;  %v934_v15 = vadd.f32 %v1501_v51, %v651_v13  ;;  %v540_v16 = vpop.f32.mrb[30].mxu0  ;;  %v653_v17 = vpop.f32.mrb[30].mxu1 }
 0x157   :  { %v935_v18 = vadd.f32 %v1495_v48, %v540_v16  ;;  %v937_v19 = vadd.f32 %v1497_v49, %v653_v17  ;;  %v542_v20 = vpop.f32.mrb[31].mxu0  ;;  %v655_v21 = vpop.f32.mrb[31].mxu1 }
 0x158   :  { %v1281_v22 = vpack.c.bf16 %v932_v14, %v931_v10  ;;  %v1282_v23 = vpack.c.bf16 %v934_v15, %v933_v11  ;;  %v936_v24 = vadd.f32 %v1499_v50, %v542_v20  ;;  %v938_v25 = vadd.f32 %v1501_v51, %v655_v21 }
 0x15a   :  { %1159 = vst [vmem:[#allocation8 + $0xe0] sm:$0xff] %v1281_v22  ;;  %1160 = vst [vmem:[#allocation8 + $0xe8] sm:$0xff] %v1282_v23  ;;  %v1283_v26 = vpack.c.bf16 %v936_v24, %v935_v18  ;;  %v1284_v27 = vpack.c.bf16 %v938_v25, %v937_v19 }
 0x15c   :  { %1161 = vst [vmem:[#allocation8 + $0xf0] sm:$0xff] %v1283_v26  ;;  %1162 = vst [vmem:[#allocation8 + $0xf8] sm:$0xff] %v1284_v27 }
 0x15d   :  { %1404 = shalt.err (!%p1401_p6)
}
 0x15e   :  { %s1405_s17 = scalar_lea.hbm %s1585_s3, 4096 }
 0x15f   :  { %p1406_p7 = scmp.ne.s32.totalorder %s1585_s3, %s1405_s17  ;;  %p1409_p8 = scmp.lt.u32.totalorder %s1405_s17, %s1585_s3 }
 0x161   :  { %p1411_p9 = pnand %p1409_p8, %p1406_p7 }
 0x163   :  { %1414 = shalt.err (!%p1411_p9)
}
 0x164   :  { %1174 = dma.vmem_to_hbm [thread:$0]  %s1169_s13, 4096, %s1585_s3, [#allocation5], %s1425_s0, %s1425_s0, %s1426_s9  }
 0x165   :  { %1419 = dma.done.wait [#allocation5], 4096  }
 0x166   :  { %1420 = vsyncadd [#allocation5], 4294963200 }
 0x167   :  { %1178 = vsyncpa [#allocation4], 1 }
 0x168   :  { %1179 = vsyncpa [#allocation7], 1 }
 0x169   :  { %1180 = vsyncpa [#allocation5], 1 }

</bundles_post_ra>
